<compile_context>
chip_gen: v7x
topology: tpu7x:2x2x1
jax: 0.10.0
libtpu: 0.0.40
codegen_flags: <defaults>
</compile_context>

<pallas_src>
import jax
import jax.numpy as jnp
import numpy as np
from jax.experimental import pallas as pl
from jax.experimental.pallas import tpu as pltpu


def _label_embedder_kernel(labels_ref, emb_ref, w_ref, b_ref, out_ref):
    # labels_ref: VMEM (b, 1) int32 (padded batch)
    # emb_ref:    VMEM (C, d)  embedding table (bf16)
    # w_ref:      VMEM (d, d)  pre-transposed linear weight (d_in, d_out) (bf16)
    # b_ref:      VMEM (1, d)  linear bias (f32)
    # out_ref:    VMEM (b, d)  f32
    b, d = out_ref.shape
    C = emb_ref.shape[0]

    # In-kernel gather as a one-hot matmul: (b, C) @ (C, d) on the MXU.
    # One-hot values are exactly representable in bf16, so the gather is exact.
    lbl = labels_ref[...]                                       # (b, 1) int32
    cls = jax.lax.broadcasted_iota(jnp.int32, (b, C), 1)        # (b, C)
    onehot = (lbl == cls).astype(emb_ref.dtype)                 # (b, C) bf16
    e = jnp.dot(onehot, emb_ref[...],
                preferred_element_type=jnp.float32)             # (b, d) f32 accum

    # SiLU in f32 on the VPU (sigmoid hits the EUP); v5e has no bf16 VPU/EUP.
    s = e * jax.nn.sigmoid(e)

    # Single batched (b, d) @ (d, d) bf16 MXU matmul with f32 accumulation.
    y = jnp.dot(s.astype(w_ref.dtype), w_ref[...],
                preferred_element_type=jnp.float32)
    out_ref[...] = (y + b_ref[...]).astype(out_ref.dtype)


def label_embedder(labels, emb_table, w_t, bias, *, mxu_dtype=jnp.bfloat16):
    """labels: (b,) int; emb_table: (C, d); w_t: (d, d) = W.T; bias: (d,) -> (b, d) f32."""
    b = labels.shape[0]
    C, d = emb_table.shape

    # Pad batch up to a multiple of 8 so the f32 output tile is sublane-dense.
    # (If batch grows, grow this single block — up to 128/256 rows — before ever
    #  adding a grid axis over b.)
    b_pad = max(8, ((b + 7) // 8) * 8)
    labels_i32 = labels.astype(jnp.int32)
    if b_pad != b:
        labels_i32 = jnp.pad(labels_i32, (0, b_pad - b))   # pad label 0 ∈ [0, C)
    labels2d = labels_i32.reshape(b_pad, 1)

    # bf16 MXU operands (halves W DMA, native MXU path); bias stays f32.
    emb_mxu = emb_table.astype(mxu_dtype)
    w_mxu = w_t.astype(mxu_dtype)
    bias2d = bias.astype(jnp.float32).reshape(1, d)

    vmem = pltpu.MemorySpace.VMEM
    out = pl.pallas_call(
        _label_embedder_kernel,
        out_shape=jax.ShapeDtypeStruct((b_pad, d), jnp.float32),
        in_specs=[
            pl.BlockSpec(memory_space=vmem),   # labels (b_pad, 1)
            pl.BlockSpec(memory_space=vmem),   # embedding table (C, d) bf16
            pl.BlockSpec(memory_space=vmem),   # weight (d, d) bf16
            pl.BlockSpec(memory_space=vmem),   # bias (1, d) f32
        ],
        out_specs=pl.BlockSpec(memory_space=vmem),
    )(labels2d, emb_mxu, w_mxu, bias2d)

    # Only pay the extra HBM copy of a slice when padding was actually needed.
    if b_pad != b:
        out = out[:b]
    return out


if __name__ == "__main__":
    key = jax.random.PRNGKey(0)
    k_emb, k_w, k_b, k_x = jax.random.split(key, 4)

    classes_num = 16
    out_channels = 128   # hidden dim d (lane-dense)
    batch = 8            # multiple of 8 -> no post-call slice

    # Deterministic synthetic parameters (shapes follow the nn.Module __init__).
    emb_table = jax.random.normal(k_emb, (classes_num, out_channels), jnp.float32)
    # PyTorch Linear weight is (out, in); store transposed (in, out) for the kernel.
    bound = 1.0 / np.sqrt(out_channels)
    w = jax.random.uniform(k_w, (out_channels, out_channels), jnp.float32, -bound, bound)
    w_t = w.T
    bias = jax.random.uniform(k_b, (out_channels,), jnp.float32, -bound, bound)

    labels = jax.random.randint(k_x, (batch,), 0, classes_num, dtype=jnp.int32)

    out = label_embedder(labels, emb_table, w_t, bias)
    out = jax.block_until_ready(out)

    # Pure-JAX reference with the same bf16 operand quantization (0/1 one-hot and
    # f32 accumulation make the kernel match this closely).
    emb_q = emb_table.astype(jnp.bfloat16).astype(jnp.float32)
    w_q = w_t.astype(jnp.bfloat16).astype(jnp.float32)
    e = emb_q[labels]
    s = e * jax.nn.sigmoid(e)
    ref = s.astype(jnp.bfloat16).astype(jnp.float32) @ w_q + bias

    assert out.shape == (batch, out_channels)
    np.testing.assert_allclose(np.asarray(out), np.asarray(ref), rtol=5e-3, atol=5e-3)

    # Sanity vs. the full-f32 module forward (loose tolerance for bf16 weights).
    e32 = emb_table[labels]
    ref32 = (e32 * jax.nn.sigmoid(e32)) @ w_t + bias
    np.testing.assert_allclose(np.asarray(out), np.asarray(ref32), rtol=2e-2, atol=2e-2)

    print("KERNEL_OK")
</pallas_src>

<mosaic_0001>
module attributes {stable_mosaic.version = 11 : i64} {
  func.func @_label_embedder_kernel(%arg0: memref<8x1xi32, #tpu.memory_space<vmem>>, %arg1: memref<16x128xbf16, #tpu.memory_space<vmem>>, %arg2: memref<128x128xbf16, #tpu.memory_space<vmem>>, %arg3: memref<1x128xf32, #tpu.memory_space<vmem>>, %arg4: memref<8x128xf32, #tpu.memory_space<vmem>>) attributes {dimension_semantics = [], scalar_prefetch = 0 : i64, scratch_operands = 0 : i64, tpu.core_type = #tpu.core_type<tc>} {
    %c0 = arith.constant 0 : index
    %c0_0 = arith.constant 0 : index
    %0 = vector.load %arg0[%c0, %c0_0] : memref<8x1xi32, #tpu.memory_space<vmem>>, vector<8x1xi32>
    %1 = tpu.iota {dimensions = array<i32: 1>} : vector<8x16xi32>
    %2 = vector.broadcast %0 : vector<8x1xi32> to vector<8x16xi32>
    %3 = arith.cmpi eq, %2, %1 : vector<8x16xi32>
    %4 = arith.extui %3 : vector<8x16xi1> to vector<8x16xi32>
    %5 = arith.sitofp %4 : vector<8x16xi32> to vector<8x16xf32>
    %6 = arith.truncf %5 : vector<8x16xf32> to vector<8x16xbf16>
    %c0_1 = arith.constant 0 : index
    %c0_2 = arith.constant 0 : index
    %7 = vector.load %arg1[%c0_1, %c0_2] : memref<16x128xbf16, #tpu.memory_space<vmem>>, vector<16x128xbf16>
    %cst = arith.constant dense<0.000000e+00> : vector<8x128xf32>
    %8 = tpu.matmul %6, %7, %cst {dimension_numbers = #tpu.dot_dimension_numbers<[1], [0], [0], [1], [0, 0, 1, 1], [], []>} : vector<8x16xbf16>, vector<16x128xbf16>, vector<8x128xf32> -> vector<8x128xf32>
    %9 = arith.negf %8 : vector<8x128xf32>
    %10 = math.exp %9 : vector<8x128xf32>
    %cst_3 = arith.constant 1.000000e+00 : f32
    %11 = vector.broadcast %cst_3 : f32 to vector<8x128xf32>
    %12 = arith.addf %11, %10 : vector<8x128xf32>
    %13 = arith.divf %11, %12 : vector<8x128xf32>
    %14 = arith.mulf %8, %13 : vector<8x128xf32>
    %15 = arith.truncf %14 : vector<8x128xf32> to vector<8x128xbf16>
    %c0_4 = arith.constant 0 : index
    %c0_5 = arith.constant 0 : index
    %16 = vector.load %arg2[%c0_4, %c0_5] : memref<128x128xbf16, #tpu.memory_space<vmem>>, vector<128x128xbf16>
    %cst_6 = arith.constant dense<0.000000e+00> : vector<8x128xf32>
    %17 = tpu.matmul %15, %16, %cst_6 {dimension_numbers = #tpu.dot_dimension_numbers<[1], [0], [0], [1], [0, 0, 1, 1], [], []>} : vector<8x128xbf16>, vector<128x128xbf16>, vector<8x128xf32> -> vector<8x128xf32>
    %c0_7 = arith.constant 0 : index
    %c0_8 = arith.constant 0 : index
    %18 = vector.load %arg3[%c0_7, %c0_8] : memref<1x128xf32, #tpu.memory_space<vmem>>, vector<1x128xf32>
    %19 = vector.broadcast %18 : vector<1x128xf32> to vector<8x128xf32>
    %20 = arith.addf %17, %19 : vector<8x128xf32>
    %c0_9 = arith.constant 0 : index
    %c0_10 = arith.constant 0 : index
    %21 = vector.load %arg4[%c0_9, %c0_10] : memref<8x128xf32, #tpu.memory_space<vmem>>, vector<8x128xf32>
    tpu.vector_store %arg4[%c0_9, %c0_10], %20 {strides = array<i32>} : memref<8x128xf32, #tpu.memory_space<vmem>>, vector<8x128xf32>,
    return
  }
}

</mosaic_0001>

<bundles_post_ra>
// kernel: tpu_custom_call.1
= control target key start
LH: loop header
LB: loop body
LE: loop exit
PB: predicated region body
PF: predicated region fallthrough
CT: control target
= control target key end

     0   :  { %9 = vsyncpa [#allocation3], 0  ;;  %s414_s0 = inlined_call_operand.vmem [shape: s32[8,1], index: 0, kind: input, shape index: {}]   ;;  %s415_s1 = inlined_call_operand.vmem [shape: bf16[16,128], index: 1, kind: input, shape index: {}]   ;;  %s416_s2 = inlined_call_operand.hbm [shape: bf16[128,128], index: 2, kind: input, shape index: {}]   ;;  %s417_s3 = inlined_call_operand.vmem [shape: f32[1,128], index: 3, kind: input, shape index: {}]   ;;  %s418_s4 = inlined_call_operand.hbm [shape: f32[8,128], index: 4, kind: output, shape index: {}]  }
   0x1   :  { %10 = vsyncpa [#allocation4], 0  ;;  %s349_s15 = smov [#allocation2]   ;;  %s301_s19 = scalar_lea.hbm %s416_s2, 1024 }
   0x2   :  { %s20_s16 = sshll.u32 %s349_s15, 4  ;;  %p302_p0 = scmp.ne.s32.totalorder %s416_s2, %s301_s19  ;;  %s21_s16 = int_to_ptr.vmem [resolvable:$true] %s20_s16 }
   0x3   :  { %p305_p1 = scmp.lt.u32.totalorder %s301_s19, %s416_s2 }
   0x5   :  { %p307_p2 = pnand %p305_p1, %p302_p0 }
   0x7   :  { %310 = shalt.err (!%p307_p2)
}
   0x8   :  { %s311_s24 = scalar_lea.vmem %s21_s16, 1024  ;;  %p316_p4 = scmp.lt.s32.totalorder %s21_s16, %s21_s16 }
   0x9   :  { %p312_p3 = scmp.ne.s32.totalorder %s21_s16, %s311_s24  ;;  %p317_p5 = scmp.lt.s32.totalorder %s311_s24, %s311_s24 }
   0xb   :  { %p318_p6 = por %p317_p5, %p316_p4 }
   0xd   :  { %p319_p7 = pnand %p318_p6, %p312_p3 }
   0xf   :  { %322 = shalt.err (!%p319_p7)
}
  0x10   :  { %s350_s25 = smov 64   ;;  %s351_s26 = smov 4  }
  0x11   :  { %26 = dma.hbm_to_vmem [thread:$0]  %s416_s2, 1024, %s21_s16, [#allocation3], %s350_s25, %s350_s25, %s351_s26  }
  0x12   :  { %345 = dma.done.wait [#allocation3], 1024  }
  0x13   :  { %346 = vsyncadd [#allocation3], 4294966272  ;;  %v352_v0 = vmov 0   ;;  %v353_v1 = vmov 0.0   ;;  %v33_v2 = vld [vmem:[%s414_s0] sm:$0xff]  ;;  %vm354_vm0 = vmmov 0   ;;  %v34_v4 = vlaneseq }
  0x14   :  { %287 = vset.pattern.permute.xlu0 %v352_v0  ;;  %254 = vmatprep.subr.bf16.mxu0 %v353_v1  ;;  %v288_v3 = vld [vmem:[%s415_s1] sm:$0xff]   ;;  %vm51_vm2 = vcmask 130048   ;;  %v289_v9 = vld [vmem:[#allocation2] sm:$0xff]   ;;  %v291_v11 = vld [vmem:[#allocation2 + $0x10] sm:$0xff]   ;;  %s355_s2 = smov [#allocation5]  }
  0x15   :  { %260 = vmatprep.subr.bf16.mxu1 %v353_v1  ;;  %37 = vperm.xlu0 %287, %v33_v2   ;;  %v35_v5 = vand.u32 127, %v34_v4  ;;  %v290_v10 = vld [vmem:[#allocation2 + $0x8] sm:$0xff]   ;;  %v292_v12 = vld [vmem:[#allocation2 + $0x18] sm:$0xff]   ;;  %v293_v13 = vld [vmem:[#allocation2 + $0x20] sm:$0xff]   ;;  %s221_s7 = sshll.u32 %s355_s2, 4  ;;  %s222_s7 = int_to_ptr.vmem [resolvable:$true] %s221_s7 }
  0x16   :  { %255 = vmatpush3.bf16.msra.mxu0 %v288_v3  ;;  %256 = vmatprep.mubr.msk.bf16.mxu0 %vm354_vm0, %v353_v1  ;;  %v294_v14 = vld [vmem:[#allocation2 + $0x28] sm:$0xff]   ;;  %v295_v15 = vld [vmem:[#allocation2 + $0x30] sm:$0xff]   ;;  %v296_v16 = vld [vmem:[#allocation2 + $0x38] sm:$0xff]   ;;  %s323_s8 = scalar_lea.vmem %s222_s7, 128  ;;  %p328_p9 = scmp.lt.s32.totalorder %s222_s7, %s222_s7 }
  0x17   :  { %276 = vmatprep.mubr.msk.bf16.mxu1 %vm354_vm0, %v353_v1  ;;  %261 = vmatpush3.bf16.msra.mxu1 %v289_v9  ;;  %v234_v27 = vld [vmem:[%s417_s3] ss:$0 sm:$0xff]  ;;  %p324_p8 = scmp.ne.s32.totalorder %s222_s7, %s323_s8  ;;  %p329_p10 = scmp.lt.s32.totalorder %s323_s8, %s323_s8 }
  0x18   :  { %262 = vmatprep.subr.bf16.mxu1 %v353_v1 }
  0x19   :  { %p330_p11 = por %p329_p10, %p328_p9 }
  0x1b   :  { %263 = vmatpush3.bf16.msra.mxu1 %v290_v10  ;;  %p331_p12 = pnand %p330_p11, %p324_p8 }
  0x1c   :  { %264 = vmatprep.subr.bf16.mxu1 %v353_v1 }
  0x1f   :  { %265 = vmatpush3.bf16.msra.mxu1 %v291_v11 }
  0x20   :  { %266 = vmatprep.subr.bf16.mxu1 %v353_v1 }
  0x23   :  { %267 = vmatpush3.bf16.msra.mxu1 %v292_v12 }
  0x24   :  { %268 = vmatprep.subr.bf16.mxu1 %v353_v1 }
  0x27   :  { %269 = vmatpush3.bf16.msra.mxu1 %v293_v13 }
  0x28   :  { %270 = vmatprep.subr.bf16.mxu1 %v353_v1 }
  0x2b   :  { %271 = vmatpush3.bf16.msra.mxu1 %v294_v14 }
  0x2c   :  { %272 = vmatprep.subr.bf16.mxu1 %v353_v1 }
  0x2f   :  { %273 = vmatpush3.bf16.msra.mxu1 %v295_v15 }
  0x30   :  { %274 = vmatprep.subr.bf16.mxu1 %v353_v1 }
  0x33   :  { %275 = vmatpush3.bf16.msra.mxu1 %v296_v16 }
  0x94   :  { %v38_v6 = vpop.permute.xlu0 %37 }
  0x95   :  { %vm39_vm1 = vcmp.eq.s32.totalorder %v38_v6, %v35_v5 }
  0x96   :  { %v230_v7 = vsel %vm39_vm1, 1.0, %v353_v1 }
  0x97   :  { %v42_v8 = vpack.c.bf16 %v230_v7, %v230_v7 }
  0x99   :  { %257 = vmatmul.mubr.msk.bf16.vlgmr.msra.gmra.mrb[0].mxu0 %vm51_vm2, %v42_v8 }
 0x16c   :  { %v89_v17 = vpop.f32.mrb[0].mxu0 }
 0x16d   :  { %v233_v18 = vmul.f32 -1.442695, %v89_v17  ;;  %v258_v19 = vpop.f32.mrb[1].mxu0 }
 0x16e   :  { %v92_v20 = vpop.f32.mrb[2].mxu0 }
 0x16f   :  { %297 = vpow2.f32 %v233_v18  ;;  %v259_v21 = vpop.f32.mrb[3].mxu0 }
 0x179   :  { %v298_v22 = vpop.eup %297 }
 0x17a   :  { %v98_v23 = vadd.f32 1.0, %v298_v22 }
 0x17c   :  { %299 = vrcp.f32 %v98_v23 }
 0x186   :  { %v300_v24 = vpop.eup %299 }
 0x187   :  { %v101_v25 = vmul.f32 %v300_v24, %v89_v17 }
 0x189   :  { %v102_v26 = vpack.c.bf16 %v101_v25, %v101_v25 }
 0x18b   :  { %277 = vmatmul.mubr.bf16.vlgmr.msra.gmra.mrb[0].mxu1 %v102_v26 }
 0x25e   :  { %v208_v28 = vpop.f32.mrb[0].mxu1 }
 0x25f   :  { %v209_v29 = vadd.f32 %v234_v27, %v208_v28  ;;  %v278_v30 = vpop.f32.mrb[1].mxu1 }
 0x260   :  { %v211_v31 = vpop.f32.mrb[2].mxu1 }
 0x261   :  { %214 = vst [vmem:[#allocation5] sm:$0xff] %v209_v29  ;;  %v279_v32 = vpop.f32.mrb[3].mxu1 }
 0x262   :  { %334 = shalt.err (!%p331_p12)
}
 0x263   :  { %s335_s3 = scalar_lea.hbm %s418_s4, 128 }
 0x264   :  { %p336_p13 = scmp.ne.s32.totalorder %s418_s4, %s335_s3  ;;  %p339_p0 = scmp.lt.u32.totalorder %s335_s3, %s418_s4 }
 0x266   :  { %p341_p1 = pnand %p339_p0, %p336_p13 }
 0x268   :  { %344 = shalt.err (!%p341_p1)
}
 0x269   :  { %224 = dma.vmem_to_hbm [thread:$0]  %s222_s7, 128, %s418_s4, [#allocation4]  }
 0x26a   :  { %347 = dma.done.wait [#allocation4], 128  }
 0x26b   :  { %348 = vsyncadd [#allocation4], 4294967168 }
 0x26c   :  { %228 = vsyncpa [#allocation3], 1 }
 0x26d   :  { %229 = vsyncpa [#allocation4], 1 }

</bundles_post_ra>
